<compile_context>
chip_gen: v7x
topology: tpu7x:2x2x1
jax: 0.10.0
libtpu: 0.0.40
codegen_flags: <defaults>
</compile_context>

<pallas_src>
import functools

import jax
import jax.numpy as jnp
from jax.experimental import pallas as pl
from jax.experimental.pallas import tpu as pltpu


def decoder_kernel(x_ref, y_ref, w1_ref, b1_ref, w2_ref, b2_ref, w3_ref, b3_ref,
                   o_ref, *, bt, hw, chunk):
    # x_ref: [Bt, P, HW] (mat dtype), y_ref: [Bt, 1, HW] (mat dtype)
    # w1: [64, P], w2: [128, 64] (mat dtype); w3: [1, 128], biases f32.
    # o_ref: [Bt, 1, HW] f32.
    for b in range(bt):                        # static unroll over images in the block
        for start in range(0, hw, chunk):      # static unroll over pixel chunks
            size = min(chunk, hw - start)
            ds = pl.ds(start, size)

            # Mask broadcast over P.  y is a 0/1 mask -> exact in bf16 too.
            xm = x_ref[b, :, ds] * y_ref[b, :, ds]                    # [P, size]

            # Conv1x1 P -> 64 on the MXU, f32 accumulate / bias / ReLU.
            h1 = jnp.dot(w1_ref[...], xm,
                         preferred_element_type=jnp.float32) + b1_ref[...]
            h1 = jnp.maximum(h1, 0.0)                                 # [64, size] f32

            # Conv1x1 64 -> 128.
            h2 = jnp.dot(w2_ref[...], h1.astype(w2_ref.dtype),
                         preferred_element_type=jnp.float32) + b2_ref[...]
            h2 = jnp.maximum(h2, 0.0)                                 # [128, size] f32

            # Conv1x1 128 -> 1: tiny [1,128] @ [128,size] matmul on the MXU
            # (FLOPs trivial, MXU has slack) -- avoids materializing a
            # [128,size] elementwise temporary and keeps the output lane-dense.
            h3 = jnp.dot(w3_ref[...], h2,
                         preferred_element_type=jnp.float32) + b3_ref[...]
            o_ref[b, :, ds] = jnp.maximum(h3, 0.0)                    # [1, size]


def _pick_batch_block(B, target):
    """Largest divisor of B that is <= target while keeping >=2 grid steps
    (so both v7x TensorCores get work when B >= 2)."""
    best = 1
    for d in range(1, min(B, target) + 1):
        if B % d == 0 and (B // d >= 2 or B == 1):
            best = d
    return best


def decoder_forward(x, y, params, *, use_bf16=True, chunk_lanes=256, batch_block=8):
    """x: [B,1,P,H,W], y: [B,1,H,W] -> [B,1,H,W] (float32)."""
    w1, b1, w2, b2, w3, b3 = params            # w: [Co, Ci], b: [Co, 1]
    B, Cx, P, H, W = x.shape
    By, Cy, Hy, Wy = y.shape
    assert (Cx, Cy) == (1, 1)
    assert (B, H, W) == (By, Hy, Wy)

    hw = H * W
    mat_dtype = jnp.bfloat16 if use_bf16 else jnp.float32

    # Natural channel-major flattening (free reshape, no HBM transpose).
    # bf16 cast halves the dominant x HBM stream; f32 accumulation in-kernel.
    x3 = x.reshape(B, P, hw).astype(mat_dtype)
    y3 = y.reshape(B, 1, hw).astype(mat_dtype)

    w1m = w1.astype(mat_dtype)                 # [64, P]
    w2m = w2.astype(mat_dtype)                 # [128, 64]
    w3f = w3.astype(jnp.float32)               # [1, 128] (exact f32 stage-3 matmul)
    b1f = b1.astype(jnp.float32)               # [64, 1]
    b2f = b2.astype(jnp.float32)               # [128, 1]
    b3f = b3.astype(jnp.float32)               # [1, 1]

    bt = _pick_batch_block(B, int(batch_block))
    grid = (B // bt,)
    chunk = max(128, (int(chunk_lanes) // 128) * 128)

    kern = functools.partial(decoder_kernel, bt=bt, hw=hw, chunk=chunk)

    full = lambda arr: pl.BlockSpec(arr.shape, lambda i: (0, 0))

    in_bpe = 2 if use_bf16 else 4
    flops = 2 * B * hw * (P * 64 + 64 * 128 + 128)
    bytes_accessed = in_bpe * B * hw * (P + 1) + 4 * B * hw   # x + y in, out
    cost = pl.CostEstimate(flops=int(flops), transcendentals=0,
                           bytes_accessed=int(bytes_accessed))

    out3 = pl.pallas_call(
        kern,
        out_shape=jax.ShapeDtypeStruct((B, 1, hw), jnp.float32),
        grid_spec=pltpu.PrefetchScalarGridSpec(
            num_scalar_prefetch=0,
            grid=grid,
            in_specs=[
                pl.BlockSpec((bt, P, hw), lambda i: (i, 0, 0)),   # x block
                pl.BlockSpec((bt, 1, hw), lambda i: (i, 0, 0)),   # y block
                full(w1m), full(b1f),
                full(w2m), full(b2f),
                full(w3f), full(b3f),
            ],
            out_specs=pl.BlockSpec((bt, 1, hw), lambda i: (i, 0, 0)),
        ),
        compiler_params=pltpu.CompilerParams(
            dimension_semantics=("parallel",)),
        cost_estimate=cost,
    )(x3, y3, w1m, b1f, w2m, b2f, w3f, b3f)

    return out3.reshape(B, 1, H, W)


def init_params(key, P=16):
    """Deterministic synthetic weights for the three 1x1 convs.

    Conv2d(Ci, Co, kernel_size=1) weight [Co, Ci, 1, 1] is stored channel-major
    as [Co, Ci]; bias as [Co, 1] (matches the channel-major kernel layout).
    """
    k1, k2, k3, k4, k5, k6 = jax.random.split(key, 6)
    w1 = jax.random.normal(k1, (64, P), jnp.float32) * 0.1
    b1 = jax.random.normal(k2, (64, 1), jnp.float32) * 0.1
    w2 = jax.random.normal(k3, (128, 64), jnp.float32) * 0.1
    b2 = jax.random.normal(k4, (128, 1), jnp.float32) * 0.1
    w3 = jax.random.normal(k5, (1, 128), jnp.float32) * 0.1
    b3 = jax.random.normal(k6, (1, 1), jnp.float32) * 0.1
    return (w1, b1, w2, b2, w3, b3)


def decoder_reference(x, y, params):
    """Pure-JAX reference matching the PyTorch module."""
    w1, b1, w2, b2, w3, b3 = params
    B, _, P, H, W = x.shape
    xm = x.reshape(B, P, H, W) * y.reshape(B, 1, H, W)              # [B,P,H,W]
    f = xm.reshape(B, P, H * W)                                     # [B,P,N]
    h1 = jax.nn.relu(jnp.einsum('op,bpn->bon', w1, f) + b1[None])
    h2 = jax.nn.relu(jnp.einsum('oc,bcn->bon', w2, h1) + b2[None])
    h3 = jax.nn.relu(jnp.einsum('oc,bcn->bon', w3, h2) + b3[None])  # [B,1,N]
    return h3.reshape(B, 1, H, W)


# TODO(synk): Decoder.create_mask (norm-threshold mask) is not part of this
# forward path (y is always provided here), so it is not implemented.

if __name__ == "__main__":
    B, P, H, W = 2, 16, 16, 16
    key = jax.random.PRNGKey(0)
    kx, ky, kp = jax.random.split(key, 3)

    x = jax.random.normal(kx, (B, 1, P, H, W), jnp.float32)
    # binary-ish mask like create_mask would produce
    y = (jax.random.uniform(ky, (B, 1, H, W)) > 0.5).astype(jnp.float32)

    params = init_params(kp, P=P)
    ref = decoder_reference(x, y, params)

    # Exact f32-operand path (tight tolerance).
    out_f32 = jax.block_until_ready(decoder_forward(x, y, params, use_bf16=False))
    assert out_f32.shape == (B, 1, H, W)
    assert jnp.allclose(out_f32, ref, atol=1e-5, rtol=1e-5), "f32 mismatch vs reference"

    # Default fast path: bf16 HBM inputs + bf16 MXU operands, f32 accumulation,
    # f32 bias/mask/ReLU.  Looser tolerance: x is quantized to bf16 (mask is
    # exact), then three matmuls with bf16 operands.
    out_bf16 = jax.block_until_ready(decoder_forward(x, y, params))
    assert out_bf16.shape == (B, 1, H, W)
    assert jnp.allclose(out_bf16, ref, atol=5e-2, rtol=5e-2), "bf16 mismatch vs reference"

    print("KERNEL_OK")
</pallas_src>

<mosaic_0001>
module attributes {stable_mosaic.version = 11 : i64} {
  func.func @decoder_kernel(%arg0: i32, %arg1: memref<1x16x256xf32, #tpu.memory_space<vmem>>, %arg2: memref<1x1x256xf32, #tpu.memory_space<vmem>>, %arg3: memref<64x16xf32, #tpu.memory_space<vmem>>, %arg4: memref<64x1xf32, #tpu.memory_space<vmem>>, %arg5: memref<128x64xf32, #tpu.memory_space<vmem>>, %arg6: memref<128x1xf32, #tpu.memory_space<vmem>>, %arg7: memref<1x128xf32, #tpu.memory_space<vmem>>, %arg8: memref<1x1xf32, #tpu.memory_space<vmem>>, %arg9: memref<1x1x256xf32, #tpu.memory_space<vmem>>) attributes {dimension_semantics = [#tpu.dimension_semantics<parallel>], iteration_bounds = array<i64: 2>, scalar_prefetch = 0 : i64, scratch_operands = 0 : i64, tpu.core_type = #tpu.core_type<tc>, window_params = [{transform_indices = @transform_0, window_bounds = array<i64: 1, 16, 256>}, {transform_indices = @transform_1, window_bounds = array<i64: 1, 1, 256>}, {pipeline_mode = #tpu.pipeline_mode<synchronous>, transform_indices = @transform_2, window_bounds = array<i64: 64, 16>}, {pipeline_mode = #tpu.pipeline_mode<synchronous>, transform_indices = @transform_3, window_bounds = array<i64: 64, 1>}, {pipeline_mode = #tpu.pipeline_mode<synchronous>, transform_indices = @transform_4, window_bounds = array<i64: 128, 64>}, {pipeline_mode = #tpu.pipeline_mode<synchronous>, transform_indices = @transform_5, window_bounds = array<i64: 128, 1>}, {pipeline_mode = #tpu.pipeline_mode<synchronous>, transform_indices = @transform_6, window_bounds = array<i64: 1, 128>}, {pipeline_mode = #tpu.pipeline_mode<synchronous>, transform_indices = @transform_7, window_bounds = array<i64: 1, 1>}, {transform_indices = @transform_8, window_bounds = array<i64: 1, 1, 256>}]} {
    %c0 = arith.constant 0 : index
    %c0_0 = arith.constant 0 : index
    %c0_1 = arith.constant 0 : index
    %0 = vector.load %arg1[%c0, %c0_0, %c0_1] : memref<1x16x256xf32, #tpu.memory_space<vmem>>, vector<1x16x256xf32>
    %1 = vector.shape_cast %0 : vector<1x16x256xf32> to vector<16x256xf32>
    %c0_2 = arith.constant 0 : index
    %c0_3 = arith.constant 0 : index
    %c0_4 = arith.constant 0 : index
    %2 = vector.load %arg2[%c0_2, %c0_3, %c0_4] : memref<1x1x256xf32, #tpu.memory_space<vmem>>, vector<1x1x256xf32>
    %3 = vector.shape_cast %2 : vector<1x1x256xf32> to vector<1x256xf32>
    %4 = vector.broadcast %3 : vector<1x256xf32> to vector<16x256xf32>
    %5 = arith.mulf %1, %4 : vector<16x256xf32>
    %c0_5 = arith.constant 0 : index
    %c0_6 = arith.constant 0 : index
    %6 = vector.load %arg3[%c0_5, %c0_6] : memref<64x16xf32, #tpu.memory_space<vmem>>, vector<64x16xf32>
    %cst = arith.constant dense<0.000000e+00> : vector<64x256xf32>
    %7 = tpu.matmul %6, %5, %cst {dimension_numbers = #tpu.dot_dimension_numbers<[1], [0], [0], [1], [0, 0, 1, 1], [], []>} : vector<64x16xf32>, vector<16x256xf32>, vector<64x256xf32> -> vector<64x256xf32>
    %c0_7 = arith.constant 0 : index
    %c0_8 = arith.constant 0 : index
    %8 = vector.load %arg4[%c0_7, %c0_8] : memref<64x1xf32, #tpu.memory_space<vmem>>, vector<64x1xf32>
    %9 = vector.broadcast %8 : vector<64x1xf32> to vector<64x256xf32>
    %10 = arith.addf %7, %9 : vector<64x256xf32>
    %cst_9 = arith.constant 0.000000e+00 : f32
    %11 = vector.broadcast %cst_9 : f32 to vector<64x256xf32>
    %12 = arith.maximumf %10, %11 : vector<64x256xf32>
    %c0_10 = arith.constant 0 : index
    %c0_11 = arith.constant 0 : index
    %13 = vector.load %arg5[%c0_10, %c0_11] : memref<128x64xf32, #tpu.memory_space<vmem>>, vector<128x64xf32>
    %cst_12 = arith.constant dense<0.000000e+00> : vector<128x256xf32>
    %14 = tpu.matmul %13, %12, %cst_12 {dimension_numbers = #tpu.dot_dimension_numbers<[1], [0], [0], [1], [0, 0, 1, 1], [], []>} : vector<128x64xf32>, vector<64x256xf32>, vector<128x256xf32> -> vector<128x256xf32>
    %c0_13 = arith.constant 0 : index
    %c0_14 = arith.constant 0 : index
    %15 = vector.load %arg6[%c0_13, %c0_14] : memref<128x1xf32, #tpu.memory_space<vmem>>, vector<128x1xf32>
    %16 = vector.broadcast %15 : vector<128x1xf32> to vector<128x256xf32>
    %17 = arith.addf %14, %16 : vector<128x256xf32>
    %cst_15 = arith.constant 0.000000e+00 : f32
    %18 = vector.broadcast %cst_15 : f32 to vector<128x256xf32>
    %19 = arith.maximumf %17, %18 : vector<128x256xf32>
    %c0_16 = arith.constant 0 : index
    %c0_17 = arith.constant 0 : index
    %20 = vector.load %arg7[%c0_16, %c0_17] : memref<1x128xf32, #tpu.memory_space<vmem>>, vector<1x128xf32>
    %cst_18 = arith.constant dense<0.000000e+00> : vector<1x256xf32>
    %21 = tpu.matmul %20, %19, %cst_18 {dimension_numbers = #tpu.dot_dimension_numbers<[1], [0], [0], [1], [0, 0, 1, 1], [], []>} : vector<1x128xf32>, vector<128x256xf32>, vector<1x256xf32> -> vector<1x256xf32>
    %c0_19 = arith.constant 0 : index
    %c0_20 = arith.constant 0 : index
    %22 = vector.load %arg8[%c0_19, %c0_20] : memref<1x1xf32, #tpu.memory_space<vmem>>, vector<1x1xf32>
    %23 = vector.broadcast %22 : vector<1x1xf32> to vector<1x256xf32>
    %24 = arith.addf %21, %23 : vector<1x256xf32>
    %cst_21 = arith.constant 0.000000e+00 : f32
    %25 = vector.broadcast %cst_21 : f32 to vector<1x256xf32>
    %26 = arith.maximumf %24, %25 : vector<1x256xf32>
    %c0_22 = arith.constant 0 : index
    %c0_23 = arith.constant 0 : index
    %c0_24 = arith.constant 0 : index
    %27 = vector.load %arg9[%c0_22, %c0_23, %c0_24] : memref<1x1x256xf32, #tpu.memory_space<vmem>>, vector<1x1x256xf32>
    %28 = vector.shape_cast %27 : vector<1x1x256xf32> to vector<1x256xf32>
    %29 = vector.shape_cast %26 : vector<1x256xf32> to vector<1x1x256xf32>
    tpu.vector_store %arg9[%c0_22, %c0_23, %c0_24], %29 {strides = array<i32>} : memref<1x1x256xf32, #tpu.memory_space<vmem>>, vector<1x1x256xf32>,
    return
  }
  func.func @transform_0(%arg0: i32) -> (i32, i32, i32) {
    %c0_i32 = arith.constant 0 : i32
    %c0_i32_0 = arith.constant 0 : i32
    %c0_i32_1 = arith.constant 0 : i32
    return %arg0, %c0_i32, %c0_i32_0 : i32, i32, i32
  }
  func.func @transform_1(%arg0: i32) -> (i32, i32, i32) {
    %c0_i32 = arith.constant 0 : i32
    %c0_i32_0 = arith.constant 0 : i32
    %c0_i32_1 = arith.constant 0 : i32
    return %arg0, %c0_i32, %c0_i32_0 : i32, i32, i32
  }
  func.func @transform_2(%arg0: i32) -> (i32, i32) {
    %c0_i32 = arith.constant 0 : i32
    %c0_i32_0 = arith.constant 0 : i32
    %c0_i32_1 = arith.constant 0 : i32
    return %c0_i32, %c0_i32_0 : i32, i32
  }
  func.func @transform_3(%arg0: i32) -> (i32, i32) {
    %c0_i32 = arith.constant 0 : i32
    %c0_i32_0 = arith.constant 0 : i32
    %c0_i32_1 = arith.constant 0 : i32
    return %c0_i32, %c0_i32_0 : i32, i32
  }
  func.func @transform_4(%arg0: i32) -> (i32, i32) {
    %c0_i32 = arith.constant 0 : i32
    %c0_i32_0 = arith.constant 0 : i32
    %c0_i32_1 = arith.constant 0 : i32
    return %c0_i32, %c0_i32_0 : i32, i32
  }
  func.func @transform_5(%arg0: i32) -> (i32, i32) {
    %c0_i32 = arith.constant 0 : i32
    %c0_i32_0 = arith.constant 0 : i32
    %c0_i32_1 = arith.constant 0 : i32
    return %c0_i32, %c0_i32_0 : i32, i32
  }
  func.func @transform_6(%arg0: i32) -> (i32, i32) {
    %c0_i32 = arith.constant 0 : i32
    %c0_i32_0 = arith.constant 0 : i32
    %c0_i32_1 = arith.constant 0 : i32
    return %c0_i32, %c0_i32_0 : i32, i32
  }
  func.func @transform_7(%arg0: i32) -> (i32, i32) {
    %c0_i32 = arith.constant 0 : i32
    %c0_i32_0 = arith.constant 0 : i32
    %c0_i32_1 = arith.constant 0 : i32
    return %c0_i32, %c0_i32_0 : i32, i32
  }
  func.func @transform_8(%arg0: i32) -> (i32, i32, i32) {
    %c0_i32 = arith.constant 0 : i32
    %c0_i32_0 = arith.constant 0 : i32
    %c0_i32_1 = arith.constant 0 : i32
    return %arg0, %c0_i32, %c0_i32_0 : i32, i32, i32
  }
}

</mosaic_0001>

<bundles_post_ra>
// kernel: tpu_custom_call.1
= control target key start
LH: loop header
LB: loop body
LE: loop exit
PB: predicated region body
PF: predicated region fallthrough
CT: control target
= control target key end

     0   :  { %s1661_s0 = inlined_call_operand.vmem [shape: f32[2,16,256], index: 0, kind: input, shape index: {}]   ;;  %s1662_s1 = inlined_call_operand.vmem [shape: f32[2,1,256], index: 1, kind: input, shape index: {}]   ;;  %s1663_s2 = inlined_call_operand.vmem [shape: f32[64,16], index: 2, kind: input, shape index: {}]   ;;  %s1664_s3 = inlined_call_operand.vmem [shape: f32[64,1], index: 3, kind: input, shape index: {}]   ;;  %s1665_s4 = inlined_call_operand.vmem [shape: f32[128,64], index: 4, kind: input, shape index: {}]   ;;  %s1666_s5 = inlined_call_operand.vmem [shape: f32[128,1], index: 5, kind: input, shape index: {}]   ;;  %s1667_s6 = inlined_call_operand.vmem [shape: f32[1,128], index: 6, kind: input, shape index: {}]   ;;  %s1668_s7 = inlined_call_operand.<no memory space> [shape: f32[1,1], index: 7, kind: input, shape index: {}]   ;;  %s1669_s8 = inlined_call_operand.hbm [shape: f32[2,1,256], index: 8, kind: output, shape index: {}]  }
   0x1   :  { %v13_v0 = vstv %s1668_s7 }
   0x2   :  { %14 = vst [vmem:[#allocation2] sm:$0x1] %v13_v0 }
   0x3   :  { %15 = vsyncpa [#allocation4], 0 }
   0x4   :  { %17 = vsyncpa [#allocation4 + $0x1], 0  ;;  %s1351_s29 = smov 0   ;;  %s1353_s30 = smov 0  }
   0x5   :  { %s1355_s9 = smov 0   ;;  %s1357_s10 = smov 0  }
   0x6 LB: > { %s1372_s7 = sadd.s32 4294967295, %s1297_s10   ;;  %s1100_s11 = sadd.s32 4294967294, %s1297_s10   ;;  %s1297_s10 = sphi %s1357_s10, %s1675_s10   ;;  %s1293_s9 = sphi %s1355_s9, %s1674_s9   ;;  %s1289_s30 = sphi %s1353_s30, %s1673_s30   ;;  %s1285_s29 = sphi %s1351_s29, %s1672_s29  }
   0x7   : > { %s1376_s12 = sadd.s32 1, %s1297_s10   ;;  %s208_s13 = sadd.s32 1, %s1293_s9 }
   0x8   : > { %s205_s14 = ssub.s32 %s1297_s10, %s1376_s12  ;;  %p218_p0 = scmp.ne.s32.totalorder %s1293_s9, %s1289_s30 }
   0x9   : > { %p206_p1 = scmp.eq.s32.totalorder %s205_s14, 0  ;;  %p219_p2 = scmp.eq.s32.totalorder %s1372_s7, 1 }
   0xa   : > { %p224_p3 = scmp.ne.s32.totalorder %s1289_s30, %s1285_s29  ;;  %p225_p4 = scmp.eq.s32.totalorder %s1100_s11, 1 }
   0xb   : > { %s1387_s15 = scalar_select %p206_p1, %s1293_s9, %s208_s13  }
   0xc   : > { %p1389_p5 = por %p219_p2, %p218_p0  ;;  %p1393_p6 = por %p225_p4, %p224_p3 }
   0xd   : > { %p1103_p7 = scmp.ge.s32.totalorder %s1297_s10, 1  ;;  %p276_p8 = scmp.lt.s32.totalorder %s1297_s10, 3 }
   0xf   : > { %p277_p9 = pnand %p1103_p7, %p276_p8 }
  0x10   : > { %p314_p10 = scmp.lt.s32.totalorder (!%p277_p9), %s1372_s7, 1  ;;  %v329_v1 = vlaneseq (!%p277_p9)  ;;  %v1299_v2 = vmov (!%p277_p9), 0.0   ;;  %v1300_v4 = vmov (!%p277_p9), 0   ;;  %v351_v5 = vld [vmem:[%s1664_s3] sm:$0xff] (!%p277_p9)  ;;  %v353_v6 = vld [vmem:[%s1664_s3 + $0x10] sm:$0xff] (!%p277_p9)  ;;  %v352_v9 = vld [vmem:[%s1664_s3 + $0x8] sm:$0xff] (!%p277_p9) }
  0x11   : > { %280 = sbr.rel (%p277_p9) target bundleno = 810 (0x32a), region = 52  ;;  %488 = vmatprep.mubr.f32.mxu0 (!%p277_p9), %v1299_v2  ;;  %778 = vmatprep.mubr.f32.mxu1 (!%p277_p9), %v1299_v2  ;;  %v354_v10 = vld [vmem:[%s1664_s3 + $0x18] sm:$0xff] (!%p277_p9)  ;;  %v355_v18 = vld [vmem:[%s1664_s3 + $0x20] sm:$0xff] (!%p277_p9)  ;;  %v356_v23 = vld [vmem:[%s1664_s3 + $0x28] sm:$0xff] (!%p277_p9)  ;;  %vm399_vm0 = vcmask (!%p277_p9), 130048   ;;  %vm665_vm1 = vcmask (!%p277_p9), 523264  }
  0x12   : > { %v1404_v3 = vshrl.u32 (!%p277_p9), %v329_v1, 7  ;;  %1233 = vset.pattern.permute.xlu0 (!%p277_p9), %v1300_v4  ;;  %1234 = vset.pattern.permute.xlu1 (!%p277_p9), %v1300_v4  ;;  %v357_v26 = vld [vmem:[%s1664_s3 + $0x30] sm:$0xff] (!%p277_p9)  ;;  %v358_v27 = vld [vmem:[%s1664_s3 + $0x38] sm:$0xff] (!%p277_p9)  ;;  %v343_v28 = vld [vmem:[%s1663_s2] sm:$0xff] (!%p277_p9)  ;;  %s311_s27 = sand.u32 (!%p277_p9), 1, %s1289_s30   ;;  %vm1011_vm2 = vcmp.lt.s32.totalorder (!%p277_p9), %v329_v1, 256 }
  0x13   : > { %361 = vperm.xlu0 (!%p277_p9), %1233, %v351_v5   ;;  %371 = vperm.xlu1 (!%p277_p9), %1234, %v353_v6   ;;  %v569_v29 = vld [vmem:[%s1666_s5] sm:$0xff] (!%p277_p9)  ;;  %v570_v30 = vld [vmem:[%s1666_s5 + $0x8] sm:$0xff] (!%p277_p9)  ;;  %v571_v32 = vld [vmem:[%s1666_s5 + $0x10] sm:$0xff] (!%p277_p9)  ;;  %s1104_s28 = sshll.u32 (!%p277_p9), %s311_s27, 1 }
  0x14   : > { %v335_v7 = vsub.s32 (!%p277_p9), 1, %v1404_v3  ;;  %v331_v8 = vsub.s32 (!%p277_p9), 0, %v1404_v3  ;;  %v344_v31 = vld [vmem:[%s1663_s2 + $0x8] sm:$0xff] (!%p277_p9)  ;;  %v572_v33 = vld [vmem:[%s1666_s5 + $0x18] sm:$0xff] (!%p277_p9)  ;;  %v345_v34 = vld [vmem:[%s1663_s2 + $0x10] sm:$0xff] (!%p277_p9)  ;;  %s313_s13 = scalar_lea.vmem (!%p277_p9), [#allocation3], %s1104_s28 }
  0x15   : > { %v573_v35 = vld [vmem:[%s1666_s5 + $0x20] sm:$0xff] (!%p277_p9)  ;;  %v574_v36 = vld [vmem:[%s1666_s5 + $0x28] sm:$0xff] (!%p277_p9)  ;;  %v346_v37 = vld [vmem:[%s1663_s2 + $0x18] sm:$0xff] (!%p277_p9)  ;;  %s1029_s14 = sshll.u32 (!%p277_p9), %s313_s13, 4  ;;  %s1621_s14 = int_to_ptr.vmem [resolvable:$true] %s1029_s14 }
  0x16   : > { %v575_v38 = vld [vmem:[%s1666_s5 + $0x30] sm:$0xff] (!%p277_p9)  ;;  %v576_v39 = vld [vmem:[%s1666_s5 + $0x38] sm:$0xff] (!%p277_p9)  ;;  %v347_v40 = vld [vmem:[%s1663_s2 + $0x20] sm:$0xff] (!%p277_p9)  ;;  %s1235_s22 = scalar_lea.vmem (!%p277_p9), %s1621_s14, 32 }
  0x17   : > { %366 = vperm.xlu0 (!%p277_p9), %1233, %v352_v9   ;;  %376 = vperm.xlu1 (!%p277_p9), %1234, %v354_v10   ;;  %v577_v41 = vld [vmem:[%s1666_s5 + $0x40] sm:$0xff] (!%p277_p9)  ;;  %v578_v42 = vld [vmem:[%s1666_s5 + $0x48] sm:$0xff] (!%p277_p9)  ;;  %v579_v44 = vld [vmem:[%s1666_s5 + $0x50] sm:$0xff] (!%p277_p9)  ;;  %p1236_p11 = scmp.ne.s32.totalorder (!%p277_p9), %s1621_s14, %s1235_s22 }
  0x18   : > { %s315_s18 = scalar_select %p314_p10, %s1372_s7, 1  ;;  %v348_v43 = vld [vmem:[%s1663_s2 + $0x28] sm:$0xff]  ;;  %v580_v45 = vld [vmem:[%s1666_s5 + $0x58] sm:$0xff]  ;;  %v349_v46 = vld [vmem:[%s1663_s2 + $0x30] sm:$0xff] }
  0x19   : > { %v581_v47 = vld [vmem:[%s1666_s5 + $0x60] sm:$0xff]  ;;  %v582_v48 = vld [vmem:[%s1666_s5 + $0x68] sm:$0xff]  ;;  %v350_v49 = vld [vmem:[%s1663_s2 + $0x38] sm:$0xff]  ;;  %p1237_p12 = pnand %p1236_p11, %p1389_p5 }
  0x1a   : > { %s1137_s23 = sshll.u32 %s315_s18, 5  ;;  %s1107_s24 = sshll.u32 %s315_s18, 1  ;;  %v583_v50 = vld [vmem:[%s1666_s5 + $0x70] sm:$0xff]  ;;  %v584_v51 = vld [vmem:[%s1666_s5 + $0x78] sm:$0xff]  ;;  %v908_v52 = vld [vmem:[#allocation2] sm:$0x1] }
  0x1b   : > { %s318_s11 = scalar_lea.vmem %s1661_s0, %s1137_s23  ;;  %s322_s19 = scalar_lea.vmem %s1662_s1, %s1107_s24  ;;  %381 = vperm.xlu0 %1233, %v355_v18   ;;  %386 = vperm.xlu1 %1234, %v356_v23  }
  0x1c   : > { %v324_v11 = vld [vmem:[%s318_s11 + $0x8] sm:$0xff]  ;;  %v326_v12 = vld [vmem:[%s318_s11 + $0x18] sm:$0xff]  ;;  %v327_v13 = vld [vmem:[%s322_s19] sm:$0x3]  ;;  %s1015_s18 = scalar_lea.sflag [#allocation4], %s311_s27  ;;  %p1238_p13 = pneg %p1237_p12 }
  0x1d   : > { %v336_v14 = vrot.slane %v327_v13, %v335_v7  ;;  %v323_v15 = vld [vmem:[%s318_s11] sm:$0xff]  ;;  %v325_v16 = vld [vmem:[%s318_s11 + $0x10] sm:$0xff]  ;;  %v332_v17 = vrot.slane %v327_v13, %v331_v8  ;;  %s1138_s11 = sshll.u32 %s1372_s7, 5  ;;  %s1302_s7 = smov [#allocation3]  }
  0x1e   : > { %s1619_s21 = scalar_lea.hbm %s1669_s8, %s1138_s11  ;;  %s1239_s23 = sshll.u32 %s1302_s7, 4  ;;  %s1240_s23 = int_to_ptr.vmem [resolvable:$false] %s1239_s23 }
  0x1f   : > { %v340_v19 = vmul.f32 %v336_v14, %v324_v11  ;;  %v342_v20 = vmul.f32 %v336_v14, %v326_v12  ;;  %v339_v21 = vmul.f32 %v332_v17, %v323_v15  ;;  %v341_v22 = vmul.f32 %v332_v17, %v325_v16  ;;  %391 = vperm.xlu0 %1233, %v357_v26   ;;  %s1241_s24 = scalar_lea.vmem %s1240_s23, 64  ;;  %p1242_p0 = scmp.lt.s32.totalorder %s1621_s14, %s1240_s23 }
  0x20   : > { %396 = vperm.xlu1 %1234, %v358_v27   ;;  %p1243_p1 = scmp.lt.s32.totalorder %s1241_s24, %s1235_s22 }
  0x21   : > { %v1139_v24 = vpack.c.bf16 %v342_v20, %v340_v19  ;;  %v1141_v25 = vpack.c.bf16 %v341_v22, %v339_v21 }
  0x22   : > { %p1244_p2 = por %p1243_p1, %p1242_p0 }
  0x23   : > { %1140 = vmatprep.subr.bf16.mxu0 %v1139_v24  ;;  %587 = vperm.xlu0 %1233, %v569_v29  }
  0x24   : > { %1142 = vmatpush1.bf16.msra.mxu0 %v1141_v25  ;;  %592 = vperm.xlu1 %1234, %v570_v30   ;;  %p1245_p3 = pnand %p1244_p2, %p1238_p13 }
  0x27   : > { %1108 = vmatmul.mubr.msk.f32.vlgmr.msra.gmra.mrb[0].mxu0 %vm399_vm0, %v343_v28  ;;  %597 = vperm.xlu0 %1233, %v571_v32  }
  0x28   : > { %494 = vmatprep.mubr.f32.mxu0 %v1299_v2  ;;  %602 = vperm.xlu1 %1234, %v572_v33  }
  0x2b   : > { %1109 = vmatmul.mubr.msk.f32.gmra.mrb[2].mxu0 %vm399_vm0, %v344_v31  ;;  %607 = vperm.xlu0 %1233, %v573_v35  }
  0x2c   : > { %500 = vmatprep.mubr.f32.mxu0 %v1299_v2  ;;  %612 = vperm.xlu1 %1234, %v574_v36  }
  0x2f   : > { %1110 = vmatmul.mubr.msk.f32.gmra.mrb[4].mxu0 %vm399_vm0, %v345_v34  ;;  %617 = vperm.xlu0 %1233, %v575_v38  }
  0x30   : > { %506 = vmatprep.mubr.f32.mxu0 %v1299_v2  ;;  %622 = vperm.xlu1 %1234, %v576_v39  }
  0x33   : > { %1111 = vmatmul.mubr.msk.f32.gmra.mrb[6].mxu0 %vm399_vm0, %v346_v37  ;;  %627 = vperm.xlu0 %1233, %v577_v41  }
  0x34   : > { %512 = vmatprep.mubr.f32.mxu0 %v1299_v2  ;;  %632 = vperm.xlu1 %1234, %v578_v42  }
  0x37   : > { %1112 = vmatmul.mubr.msk.f32.gmra.mrb[8].mxu0 %vm399_vm0, %v347_v40  ;;  %637 = vperm.xlu0 %1233, %v579_v44  }
  0x38   : > { %518 = vmatprep.mubr.f32.mxu0 %v1299_v2  ;;  %642 = vperm.xlu1 %1234, %v580_v45  }
  0x3b   : > { %1113 = vmatmul.mubr.msk.f32.gmra.mrb[10].mxu0 %vm399_vm0, %v348_v43  ;;  %647 = vperm.xlu0 %1233, %v581_v47  }
  0x3c   : > { %524 = vmatprep.mubr.f32.mxu0 %v1299_v2  ;;  %652 = vperm.xlu1 %1234, %v582_v48  }
  0x3f   : > { %1114 = vmatmul.mubr.msk.f32.gmra.mrb[12].mxu0 %vm399_vm0, %v349_v46  ;;  %657 = vperm.xlu0 %1233, %v583_v50  }
  0x40   : > { %530 = vmatprep.mubr.f32.mxu0 %v1299_v2  ;;  %662 = vperm.xlu1 %1234, %v584_v51  }
  0x43   : > { %1115 = vmatmul.mubr.msk.f32.gmra.mrb[14].mxu0 %vm399_vm0, %v350_v49  ;;  %911 = vperm.xlu0 %1233, %v908_v52  }
  0x44   : > { %982 = vmatprep.mubr.f32.mxu0 %v1299_v2 }
  0x92   : > { %v362_v53 = vpop.permute.xlu0 %361  ;;  %v372_v62 = vpop.permute.xlu1 %371 }
  0x96   : > { %v367_v57 = vpop.permute.xlu0 %366  ;;  %v377_v13 = vpop.permute.xlu1 %376 }
  0x9a   : > { %v382_v26 = vpop.permute.xlu0 %381  ;;  %v387_v29 = vpop.permute.xlu1 %386 }
  0x9e   : > { %v392_v42 = vpop.permute.xlu0 %391 }
  0x9f   : > { %v397_v45 = vpop.permute.xlu1 %396 }
  0xfa   : > { %v490_v54 = vpop.f32.mrb[0].mxu0 }
  0xfb   : > { %v492_v55 = vpop.f32.mrb[1].mxu0  ;;  %v491_v56 = vadd.f32 %v490_v54, %v362_v53 }
  0xfc   : > { %v493_v58 = vadd.f32 %v492_v55, %v362_v53 }
  0xfd   : > { %v537_v0 = vmax.f32 %v491_v56, 0.0 }
  0xfe   : > { %v496_v59 = vpop.f32.mrb[2].mxu0  ;;  %v538_v5 = vmax.f32 %v493_v58, 0.0  ;;  %v554_v58 = vld [vmem:[%s1665_s4 + $0x8] sm:$0xff] }
  0xff   : > { %v497_v60 = vadd.f32 %v496_v59, %v367_v57  ;;  %v498_v61 = vpop.f32.mrb[3].mxu0  ;;  %v555_v59 = vld [vmem:[%s1665_s4 + $0x10] sm:$0xff] }
 0x100   : > { %v499_v63 = vadd.f32 %v498_v61, %v367_v57  ;;  %v553_v57 = vld [vmem:[%s1665_s4] sm:$0xff] }
 0x101   : > { %v539_v4 = vmax.f32 %v497_v60, 0.0  ;;  %v556_v60 = vld [vmem:[%s1665_s4 + $0x18] sm:$0xff]  ;;  %v557_v61 = vld [vmem:[%s1665_s4 + $0x20] sm:$0xff] }
 0x102   : > { %v540_v6 = vmax.f32 %v499_v63, 0.0  ;;  %v502_v7 = vpop.f32.mrb[4].mxu0  ;;  %v559_v63 = vld [vmem:[%s1665_s4 + $0x30] sm:$0xff] }
 0x103   : > { %v504_v9 = vpop.f32.mrb[5].mxu0  ;;  %v1145_v10 = vpack.c.bf16 %v539_v4, %v537_v0  ;;  %v503_v12 = vadd.f32 %v502_v7, %v372_v62  ;;  %v560_v0 = vld [vmem:[%s1665_s4 + $0x38] sm:$0xff]  ;;  %v561_v4 = vld [vmem:[%s1665_s4 + $0x40] sm:$0xff] }
 0x104   : > { %v1143_v11 = vpack.c.bf16 %v540_v6, %v538_v5  ;;  %v505_v14 = vadd.f32 %v504_v9, %v372_v62  ;;  %v558_v62 = vld [vmem:[%s1665_s4 + $0x28] sm:$0xff]  ;;  %v563_v6 = vld [vmem:[%s1665_s4 + $0x50] sm:$0xff]  ;;  %v564_v7 = vld [vmem:[%s1665_s4 + $0x58] sm:$0xff] }
 0x105   : > { %v541_v19 = vmax.f32 %v503_v12, 0.0  ;;  %v562_v5 = vld [vmem:[%s1665_s4 + $0x48] sm:$0xff]  ;;  %v565_v9 = vld [vmem:[%s1665_s4 + $0x60] sm:$0xff]  ;;  %v568_v12 = vld [vmem:[%s1665_s4 + $0x78] sm:$0xff] }
 0x106   : > { %v508_v15 = vpop.f32.mrb[6].mxu0  ;;  %1144 = vmatprep.subr.bf16.mxu1 %v1143_v11  ;;  %v542_v21 = vmax.f32 %v505_v14, 0.0  ;;  %v567_v11 = vld [vmem:[%s1665_s4 + $0x70] sm:$0xff] }
 0x107   : > { %v509_v16 = vadd.f32 %v508_v15, %v377_v13  ;;  %v510_v17 = vpop.f32.mrb[7].mxu0  ;;  %1146 = vmatpush1.bf16.msra.mxu1 %v1145_v10  ;;  %v566_v10 = vld [vmem:[%s1665_s4 + $0x68] sm:$0xff]  ;;  %v588_v15 = vpop.permute.xlu0 %587 }
 0x108   : > { %v511_v18 = vadd.f32 %v510_v17, %v377_v13  ;;  %v593_v17 = vpop.permute.xlu1 %592 }
 0x109   : > { %v543_v20 = vmax.f32 %v509_v16, 0.0 }
 0x10a   : > { %v544_v22 = vmax.f32 %v511_v18, 0.0  ;;  %v514_v23 = vpop.f32.mrb[8].mxu0 }
 0x10b   : > { %v1149_v24 = vpack.c.bf16 %v543_v20, %v541_v19  ;;  %v516_v25 = vpop.f32.mrb[9].mxu0  ;;  %v515_v28 = vadd.f32 %v514_v23, %v382_v26 }
 0x10c   : > { %v1147_v27 = vpack.c.bf16 %v544_v22, %v542_v21  ;;  %v517_v30 = vadd.f32 %v516_v25, %v382_v26 }
 0x10d   : > { %v545_v35 = vmax.f32 %v515_v28, 0.0 }
 0x10e   : > { %v520_v31 = vpop.f32.mrb[10].mxu0  ;;  %1148 = vmatprep.subr.bf16.mxu1 %v1147_v27  ;;  %v546_v37 = vmax.f32 %v517_v30, 0.0 }
 0x10f   : > { %v521_v32 = vadd.f32 %v520_v31, %v387_v29  ;;  %v522_v33 = vpop.f32.mrb[11].mxu0  ;;  %1150 = vmatpush1.bf16.msra.mxu1 %v1149_v24 }
 0x110   : > { %v523_v34 = vadd.f32 %v522_v33, %v387_v29  ;;  %v598_v29 = vpop.permute.xlu0 %597 }
 0x111   : > { %v547_v36 = vmax.f32 %v521_v32, 0.0  ;;  %v603_v32 = vpop.permute.xlu1 %602 }
 0x112   : > { %v548_v38 = vmax.f32 %v523_v34, 0.0  ;;  %v526_v39 = vpop.f32.mrb[12].mxu0 }
 0x113   : > { %v1153_v40 = vpack.c.bf16 %v547_v36, %v545_v35  ;;  %v528_v41 = vpop.f32.mrb[13].mxu0  ;;  %v527_v44 = vadd.f32 %v526_v39, %v392_v42 }
 0x114   : > { %v1151_v43 = vpack.c.bf16 %v548_v38, %v546_v37  ;;  %v529_v46 = vadd.f32 %v528_v41, %v392_v42 }
 0x115   : > { %v549_v51 = vmax.f32 %v527_v44, 0.0 }
 0x116   : > { %v532_v47 = vpop.f32.mrb[14].mxu0  ;;  %1152 = vmatprep.subr.bf16.mxu1 %v1151_v43  ;;  %v550_v53 = vmax.f32 %v529_v46, 0.0 }
 0x117   : > { %v533_v48 = vadd.f32 %v532_v47, %v397_v45  ;;  %v534_v49 = vpop.f32.mrb[15].mxu0  ;;  %1154 = vmatpush1.bf16.msra.mxu1 %v1153_v40 }
 0x118   : > { %v535_v50 = vadd.f32 %v534_v49, %v397_v45  ;;  %v608_v45 = vpop.permute.xlu0 %607 }
 0x119   : > { %v551_v52 = vmax.f32 %v533_v48, 0.0  ;;  %v613_v48 = vpop.permute.xlu1 %612 }
 0x11a   : > { %v552_v54 = vmax.f32 %v535_v50, 0.0 }
 0x11b   : > { %v1157_v55 = vpack.c.bf16 %v551_v52, %v549_v51 }
 0x11c   : > { %v1155_v56 = vpack.c.bf16 %v552_v54, %v550_v53 }
 0x11e   : > { %1156 = vmatprep.subr.bf16.mxu1 %v1155_v56 }
 0x11f   : > { %1158 = vmatpush1.bf16.msra.mxu1 %v1157_v55 }
 0x122   : > { %1116 = vmatmul.mubr.msk.f32.vlgmr.msra.gmra.mrb[0].mxu1 %vm665_vm1, %v553_v57 }
 0x123   : > { %784 = vmatprep.mubr.f32.mxu1 %v1299_v2 }
 0x126   : > { %1117 = vmatmul.mubr.msk.f32.gmra.mrb[2].mxu1 %vm665_vm1, %v554_v58 }
 0x127   : > { %790 = vmatprep.mubr.f32.mxu1 %v1299_v2 }
 0x12a   : > { %1118 = vmatmul.mubr.msk.f32.gmra.mrb[4].mxu1 %vm665_vm1, %v555_v59 }
 0x12b   : > { %796 = vmatprep.mubr.f32.mxu1 %v1299_v2 }
 0x12e   : > { %1119 = vmatmul.mubr.msk.f32.gmra.mrb[6].mxu1 %vm665_vm1, %v556_v60 }
 0x12f   : > { %802 = vmatprep.mubr.f32.mxu1 %v1299_v2 }
 0x132   : > { %1120 = vmatmul.mubr.msk.f32.gmra.mrb[8].mxu1 %vm665_vm1, %v557_v61  ;;  %v618_v61 = vpop.permute.xlu0 %617 }
 0x133   : > { %808 = vmatprep.mubr.f32.mxu1 %v1299_v2 }
 0x136   : > { %1121 = vmatmul.mubr.msk.f32.gmra.mrb[10].mxu1 %vm665_vm1, %v558_v62 }
 0x137   : > { %814 = vmatprep.mubr.f32.mxu1 %v1299_v2 }
 0x13a   : > { %1122 = vmatmul.mubr.msk.f32.gmra.mrb[12].mxu1 %vm665_vm1, %v559_v63 }
 0x13b   : > { %820 = vmatprep.mubr.f32.mxu1 %v1299_v2 }
 0x13e   : > { %1123 = vmatmul.mubr.msk.f32.gmra.mrb[14].mxu1 %vm665_vm1, %v560_v0  ;;  %v623_v0 = vpop.permute.xlu1 %622 }
 0x13f   : > { %826 = vmatprep.mubr.f32.mxu1 %v1299_v2 }
 0x142   : > { %1124 = vmatmul.mubr.msk.f32.gmra.mrb[16].mxu1 %vm665_vm1, %v561_v4 }
 0x143   : > { %832 = vmatprep.mubr.f32.mxu1 %v1299_v2 }
 0x146   : > { %1125 = vmatmul.mubr.msk.f32.gmra.mrb[18].mxu1 %vm665_vm1, %v562_v5 }
 0x147   : > { %838 = vmatprep.mubr.f32.mxu1 %v1299_v2 }
 0x14a   : > { %1126 = vmatmul.mubr.msk.f32.gmra.mrb[20].mxu1 %vm665_vm1, %v563_v6 }
 0x14b   : > { %844 = vmatprep.mubr.f32.mxu1 %v1299_v2 }
 0x14e   : > { %1127 = vmatmul.mubr.msk.f32.gmra.mrb[22].mxu1 %vm665_vm1, %v564_v7 }
 0x14f   : > { %850 = vmatprep.mubr.f32.mxu1 %v1299_v2 }
 0x152   : > { %1128 = vmatmul.mubr.msk.f32.gmra.mrb[24].mxu1 %vm665_vm1, %v565_v9 }
 0x153   : > { %856 = vmatprep.mubr.f32.mxu1 %v1299_v2 }
 0x156   : > { %1129 = vmatmul.mubr.msk.f32.gmra.mrb[26].mxu1 %vm665_vm1, %v566_v10 }
 0x157   : > { %862 = vmatprep.mubr.f32.mxu1 %v1299_v2 }
 0x15a   : > { %1130 = vmatmul.mubr.msk.f32.gmra.mrb[28].mxu1 %vm665_vm1, %v567_v11 }
 0x15b   : > { %868 = vmatprep.mubr.f32.mxu1 %v1299_v2 }
 0x15e   : > { %1131 = vmatmul.mubr.msk.f32.gmra.mrb[30].mxu1 %vm665_vm1, %v568_v12 }
 0x1f5   : > { %v780_v13 = vpop.f32.mrb[0].mxu1 }
 0x1f6   : > { %v782_v14 = vpop.f32.mrb[1].mxu1  ;;  %v781_v16 = vadd.f32 %v780_v13, %v588_v15 }
 0x1f7   : > { %v783_v18 = vadd.f32 %v782_v14, %v588_v15 }
 0x1f8   : > { %v875_v23 = vmax.f32 %v781_v16, 0.0 }
 0x1f9   : > { %v786_v19 = vpop.f32.mrb[2].mxu1  ;;  %v876_v25 = vmax.f32 %v783_v18, 0.0 }
 0x1fa   : > { %v787_v20 = vadd.f32 %v786_v19, %v593_v17  ;;  %v788_v21 = vpop.f32.mrb[3].mxu1 }
 0x1fb   : > { %v789_v22 = vadd.f32 %v788_v21, %v593_v17  ;;  %v628_v17 = vpop.permute.xlu0 %627 }
 0x1fc   : > { %v877_v24 = vmax.f32 %v787_v20, 0.0  ;;  %v633_v20 = vpop.permute.xlu1 %632 }
 0x1fd   : > { %v878_v2 = vmax.f32 %v789_v22, 0.0  ;;  %v792_v26 = vpop.f32.mrb[4].mxu1 }
 0x1fe   : > { %v1161_v27 = vpack.c.bf16 %v877_v24, %v875_v23  ;;  %v794_v28 = vpop.f32.mrb[5].mxu1  ;;  %v793_v31 = vadd.f32 %v792_v26, %v598_v29 }
 0x1ff   : > { %v1159_v30 = vpack.c.bf16 %v878_v2, %v876_v25  ;;  %v795_v33 = vadd.f32 %v794_v28, %v598_v29 }
 0x200   : > { %v879_v38 = vmax.f32 %v793_v31, 0.0 }
 0x201   : > { %v798_v34 = vpop.f32.mrb[6].mxu1  ;;  %1160 = vmatprep.subr.bf16.mxu0 %v1159_v30  ;;  %v880_v40 = vmax.f32 %v795_v33, 0.0 }
 0x202   : > { %v799_v35 = vadd.f32 %v798_v34, %v603_v32  ;;  %v800_v36 = vpop.f32.mrb[7].mxu1  ;;  %1162 = vmatpush1.bf16.msra.mxu0 %v1161_v27 }
 0x203   : > { %v801_v37 = vadd.f32 %v800_v36, %v603_v32  ;;  %v638_v32 = vpop.permute.xlu0 %637 }
 0x204   : > { %v881_v39 = vmax.f32 %v799_v35, 0.0  ;;  %v643_v35 = vpop.permute.xlu1 %642 }
 0x205   : > { %v882_v41 = vmax.f32 %v801_v37, 0.0  ;;  %v804_v42 = vpop.f32.mrb[8].mxu1 }
 0x206   : > { %v1165_v43 = vpack.c.bf16 %v881_v39, %v879_v38  ;;  %v806_v44 = vpop.f32.mrb[9].mxu1  ;;  %v805_v47 = vadd.f32 %v804_v42, %v608_v45 }
 0x207   : > { %v1163_v46 = vpack.c.bf16 %v882_v41, %v880_v40  ;;  %v807_v49 = vadd.f32 %v806_v44, %v608_v45 }
 0x208   : > { %v883_v54 = vmax.f32 %v805_v47, 0.0 }
 0x209   : > { %v810_v50 = vpop.f32.mrb[10].mxu1  ;;  %1164 = vmatprep.subr.bf16.mxu0 %v1163_v46  ;;  %v884_v56 = vmax.f32 %v807_v49, 0.0 }
 0x20a   : > { %v811_v51 = vadd.f32 %v810_v50, %v613_v48  ;;  %v812_v52 = vpop.f32.mrb[11].mxu1  ;;  %1166 = vmatpush1.bf16.msra.mxu0 %v1165_v43 }
 0x20b   : > { %v813_v53 = vadd.f32 %v812_v52, %v613_v48  ;;  %v648_v48 = vpop.permute.xlu0 %647 }
 0x20c   : > { %v885_v55 = vmax.f32 %v811_v51, 0.0  ;;  %v653_v51 = vpop.permute.xlu1 %652 }
 0x20d   : > { %v886_v57 = vmax.f32 %v813_v53, 0.0  ;;  %v816_v58 = vpop.f32.mrb[12].mxu1 }
 0x20e   : > { %v1169_v59 = vpack.c.bf16 %v885_v55, %v883_v54  ;;  %v818_v60 = vpop.f32.mrb[13].mxu1  ;;  %v817_v63 = vadd.f32 %v816_v58, %v618_v61 }
 0x20f   : > { %v1167_v62 = vpack.c.bf16 %v886_v57, %v884_v56  ;;  %v819_v4 = vadd.f32 %v818_v60, %v618_v61 }
 0x210   : > { %v887_v10 = vmax.f32 %v817_v63, 0.0 }
 0x211   : > { %v822_v5 = vpop.f32.mrb[14].mxu1  ;;  %1168 = vmatprep.subr.bf16.mxu0 %v1167_v62  ;;  %v888_v12 = vmax.f32 %v819_v4, 0.0 }
 0x212   : > { %v823_v6 = vadd.f32 %v822_v5, %v623_v0  ;;  %v824_v7 = vpop.f32.mrb[15].mxu1  ;;  %1170 = vmatpush1.bf16.msra.mxu0 %v1169_v59 }
 0x213   : > { %v825_v9 = vadd.f32 %v824_v7, %v623_v0  ;;  %v658_v0 = vpop.permute.xlu0 %657 }
 0x214   : > { %v889_v11 = vmax.f32 %v823_v6, 0.0  ;;  %v663_v6 = vpop.permute.xlu1 %662 }
 0x215   : > { %v890_v13 = vmax.f32 %v825_v9, 0.0  ;;  %v828_v14 = vpop.f32.mrb[16].mxu1 }
 0x216   : > { %v1173_v15 = vpack.c.bf16 %v889_v11, %v887_v10  ;;  %v830_v16 = vpop.f32.mrb[17].mxu1  ;;  %v829_v19 = vadd.f32 %v828_v14, %v628_v17 }
 0x217   : > { %v1171_v18 = vpack.c.bf16 %v890_v13, %v888_v12  ;;  %v831_v21 = vadd.f32 %v830_v16, %v628_v17 }
 0x218   : > { %v891_v2 = vmax.f32 %v829_v19, 0.0  ;;  %v907_v19 = vld [vmem:[%s1667_s6] sm:$0x1] }
 0x219   : > { %v834_v22 = vpop.f32.mrb[18].mxu1  ;;  %1172 = vmatprep.subr.bf16.mxu0 %v1171_v18  ;;  %v892_v27 = vmax.f32 %v831_v21, 0.0  ;;  %v1301_v21 = vmov 1966171168  }
 0x21a   : > { %v835_v23 = vadd.f32 %v834_v22, %v633_v20  ;;  %v836_v24 = vpop.f32.mrb[19].mxu1  ;;  %1174 = vmatpush1.bf16.msra.mxu0 %v1173_v15  ;;  %v995_v22 = vunpack.c.l.s4 %v1301_v21 }
 0x21b   : > { %v837_v25 = vadd.f32 %v836_v24, %v633_v20  ;;  %v912_v20 = vpop.permute.xlu0 %911 }
 0x21c   : > { %v893_v26 = vmax.f32 %v835_v23, 0.0  ;;  %v917_v23 = vrot.slane %v912_v20, %v331_v8 }
 0x21d   : > { %v894_v28 = vmax.f32 %v837_v25, 0.0  ;;  %v840_v29 = vpop.f32.mrb[20].mxu1  ;;  %v996_v25 = vunpack.c.0.s8 %v995_v22 }
 0x21e   : > { %v1177_v30 = vpack.c.bf16 %v893_v26, %v891_v2  ;;  %v842_v31 = vpop.f32.mrb[21].mxu1  ;;  %v841_v34 = vadd.f32 %v840_v29, %v638_v32 }
 0x21f   : > { %v1175_v33 = vpack.c.bf16 %v894_v28, %v892_v27  ;;  %v843_v36 = vadd.f32 %v842_v31, %v638_v32 }
 0x220   : > { %v895_v41 = vmax.f32 %v841_v34, 0.0 }
 0x221   : > { %v846_v37 = vpop.f32.mrb[22].mxu1  ;;  %1176 = vmatprep.subr.bf16.mxu0 %v1175_v33  ;;  %v896_v43 = vmax.f32 %v843_v36, 0.0 }
 0x222   : > { %v847_v38 = vadd.f32 %v846_v37, %v643_v35  ;;  %v848_v39 = vpop.f32.mrb[23].mxu1  ;;  %1178 = vmatpush1.bf16.msra.mxu0 %v1177_v30  ;;  %v999_v30 = vsub.s32 %v996_v25, %v1404_v3 }
 0x223   : > { %v849_v40 = vadd.f32 %v848_v39, %v643_v35 }
 0x224   : > { %v897_v42 = vmax.f32 %v847_v38, 0.0 }
 0x225   : > { %v898_v44 = vmax.f32 %v849_v40, 0.0  ;;  %v852_v45 = vpop.f32.mrb[24].mxu1 }
 0x226   : > { %v1181_v46 = vpack.c.bf16 %v897_v42, %v895_v41  ;;  %v854_v47 = vpop.f32.mrb[25].mxu1  ;;  %v853_v50 = vadd.f32 %v852_v45, %v648_v48 }
 0x227   : > { %v1179_v49 = vpack.c.bf16 %v898_v44, %v896_v43  ;;  %v855_v52 = vadd.f32 %v854_v47, %v648_v48 }
 0x228   : > { %v899_v57 = vmax.f32 %v853_v50, 0.0 }
 0x229   : > { %v858_v53 = vpop.f32.mrb[26].mxu1  ;;  %1180 = vmatprep.subr.bf16.mxu0 %v1179_v49  ;;  %v900_v59 = vmax.f32 %v855_v52, 0.0 }
 0x22a   : > { %v859_v54 = vadd.f32 %v858_v53, %v653_v51  ;;  %v860_v55 = vpop.f32.mrb[27].mxu1  ;;  %1182 = vmatpush1.bf16.msra.mxu0 %v1181_v46 }
 0x22b   : > { %v861_v56 = vadd.f32 %v860_v55, %v653_v51 }
 0x22c   : > { %v901_v58 = vmax.f32 %v859_v54, 0.0 }
 0x22d   : > { %v902_v60 = vmax.f32 %v861_v56, 0.0  ;;  %v864_v61 = vpop.f32.mrb[28].mxu1 }
 0x22e   : > { %v1185_v62 = vpack.c.bf16 %v901_v58, %v899_v57  ;;  %v866_v63 = vpop.f32.mrb[29].mxu1  ;;  %v865_v5 = vadd.f32 %v864_v61, %v658_v0 }
 0x22f   : > { %v1183_v4 = vpack.c.bf16 %v902_v60, %v900_v59  ;;  %v867_v7 = vadd.f32 %v866_v63, %v658_v0 }
 0x230   : > { %v903_v13 = vmax.f32 %v865_v5, 0.0 }
 0x231   : > { %v870_v9 = vpop.f32.mrb[30].mxu1  ;;  %1184 = vmatprep.subr.bf16.mxu0 %v1183_v4  ;;  %v904_v15 = vmax.f32 %v867_v7, 0.0 }
 0x232   : > { %v871_v10 = vadd.f32 %v870_v9, %v663_v6  ;;  %v872_v11 = vpop.f32.mrb[31].mxu1  ;;  %1186 = vmatpush1.bf16.msra.mxu0 %v1185_v62 }
 0x233   : > { %v873_v12 = vadd.f32 %v872_v11, %v663_v6 }
 0x234   : > { %v905_v14 = vmax.f32 %v871_v10, 0.0 }
 0x235   : > { %v906_v16 = vmax.f32 %v873_v12, 0.0 }
 0x236   : > { %v1189_v17 = vpack.c.bf16 %v905_v14, %v903_v13 }
 0x237   : > { %v1187_v18 = vpack.c.bf16 %v906_v16, %v904_v15 }
 0x239   : > { %1188 = vmatprep.subr.bf16.mxu0 %v1187_v18 }
 0x23a   : > { %1190 = vmatpush1.bf16.msra.mxu0 %v1189_v17 }
 0x23d   : > { %983 = vmatmul.mubr.f32.vlgmr.msra.gmra.mrb[16].mxu0 %v907_v19 }
 0x310   : > { %v984_v24 = vpop.f32.mrb[16].mxu0 }
 0x311   : > { %v985_v2 = vadd.f32 %v984_v24, %v917_v23  ;;  %v986_v26 = vpop.f32.mrb[17].mxu0 }
 0x312   : > { %v987_v27 = vadd.f32 %v986_v26, %v917_v23 }
 0x313   : > { %v989_v28 = vmax.f32 %v985_v2, 0.0 }
 0x314   : > { %v990_v29 = vmax.f32 %v987_v27, 0.0 }
 0x316   : > { %v993_v31 = vcombine.low %v989_v28, %v990_v29 }
 0x318   : > { %v1000_v32 = vrot.slane %v993_v31, %v999_v30 }
 0x31a   : > { %v1007_v33 = vrot.slane %v1000_v32, %v999_v30 }
 0x31c   : > { %1013 = vst.msk [vmem:[%s313_s13] sm:$0x3] %vm1011_vm2, %v1007_v33 }
 0x31d   : > { %1248 = shalt.err (!%p1245_p3)
}
 0x31e   : > { %s1249_s25 = scalar_lea.hbm %s1619_s21, 32  ;;  %s1253_s28 = scalar_lea.hbm %s1669_s8, 64 }
 0x31f   : > { %p1250_p4 = scmp.ne.s32.totalorder %s1619_s21, %s1249_s25  ;;  %p1254_p9 = scmp.lt.u32.totalorder %s1619_s21, %s1669_s8 }
 0x320   : > { %p1255_p10 = scmp.lt.u32.totalorder %s1253_s28, %s1249_s25  ;;  %p1257_p12 = scmp.lt.u32.totalorder %s1249_s25, %s1619_s21 }
 0x321   : > { %p1251_p7 = pnand %p1250_p4, %p1389_p5 }
 0x322   : > { %p1256_p11 = por %p1255_p10, %p1254_p9 }
 0x323   : > { %p1252_p8 = pneg %p1251_p7 }
 0x324   : > { %p1258_p13 = por %p1257_p12, %p1256_p11 }
 0x326   : > { %p1259_p0 = pnand %p1258_p13, %p1252_p8 }
 0x328   : > { %1262 = shalt.err (!%p1259_p0)
}
 0x329   : > { %1191 = dma.vmem_to_hbm [thread:$0]  (%p1389_p5), %s1621_s14, 32, %s1619_s21, %s1015_s18  }
 0x32a PF: > { %p1197_p1 = scmp.ge.s32.totalorder %s1297_s10, 2  ;;  %s1041_s19 = sand.u32 1, %s1285_s29  }
 0x32b   : > { %s1042_s20 = scalar_lea.sflag [#allocation4], %s1041_s19 }
 0x32c   : > { %p1194_p2 = pnand %p1197_p1, %p1393_p6 }
 0x32e   : > { %1280 = dma.done.wait (!%p1194_p2), %s1042_s20, 32  }
 0x32f   : > { %1282 = vsyncadd (!%p1194_p2), %s1042_s20, 4294967264  ;;  %p20_p3 = scmp.ge.s32.totalorder %s1376_s12, 4   ;;  %s1672_s29 = smov %s1289_s30 }
 0x330   : > { %s1673_s30 = smov %s1293_s9  ;;  %s1674_s9 = smov %s1387_s15 }
 0x331   : > { %s1675_s10 = smov %s1376_s12  ;;  %22 = sbr.rel (!%p20_p3) target bundleno = 6 (0x6), region = 90 }
 0x338   :  { %1047 = vsyncpa [#allocation4], 1 }
 0x339   :  { %1049 = vsyncpa [#allocation4 + $0x1], 1 }

</bundles_post_ra>
